<compile_context>
chip_gen: v5e
topology: v5e:2x2
jax: 0.10.0
libtpu: 0.0.40
codegen_flags: <defaults>
</compile_context>

<pallas_src>
import jax
import jax.numpy as jnp
from jax.experimental import pallas as pl
from jax.experimental.pallas import tpu as pltpu

_CPAD = 8  # zero-pad xyz channel dim 3 -> 8 so the distance matmul gets a clean K


# ----------------------------- Fused kernel ---------------------------------

def make_fused_kernel(k_neighbors, has_points1, num_extra_layers):
    def kernel(*args):
        out_ref = args[-1]
        it = iter(args[:-1])
        x1_ref = next(it)       # (1, Cpad, TN)  xyz1 tile, channels-first (padded)
        x2t_ref = next(it)      # (1, S, Cpad)   xyz2, points-as-rows (tiny)
        pts2_ref = next(it)     # (1, D2, S)     points2, channels-first
        p1_ref = next(it) if has_points1 else None   # (1, D1, TN)
        w1a_ref = next(it) if has_points1 else None  # (H1, D1)
        w1b_ref = next(it)      # (H1, D2)
        s1_ref = next(it)       # (H1, 1)
        b1_ref = next(it)       # (H1, 1)
        extra = [(next(it), next(it), next(it)) for _ in range(num_extra_layers)]

        x1 = x1_ref[0].astype(jnp.float32)        # (Cpad, TN)
        x2t = x2t_ref[0].astype(jnp.float32)      # (S, Cpad)
        S = x2t.shape[0]
        TN = x1.shape[1]

        # Squared distances d[s, n] = ||x2_s||^2 + ||x1_n||^2 - 2 x2_s.x1_n.
        # Cross term on the MXU (zero-padded channels are inert); same expanded
        # formula as the reference.
        cross = jnp.dot(x2t, x1, preferred_element_type=jnp.float32)   # (S, TN)
        d = (jnp.sum(x1 * x1, axis=0, keepdims=True)       # (1, TN)
             + jnp.sum(x2t * x2t, axis=1, keepdims=True)   # (S, 1)
             - 2.0 * cross)                                 # (S, TN)

        # k-NN selection: iterative masked min along S, with a minimal number of
        # dense (S, TN) read/write passes per iteration:
        #   * masked_iota computed once and reused for both `first` and `sel`,
        #   * the weight update is a single select (no select+add),
        #   * the dd knock-out is adjacent so the `sel` read is reused.
        iota = jax.lax.broadcasted_iota(jnp.int32, (S, TN), 0)
        w = jnp.zeros((S, TN), jnp.float32)
        dd = d
        for _ in range(k_neighbors):
            mn = jnp.min(dd, axis=0, keepdims=True)                    # (1, TN)
            masked_iota = jnp.where(dd == mn, iota, jnp.int32(S))      # (S, TN)
            first = jnp.min(masked_iota, axis=0, keepdims=True)        # (1, TN)
            sel = masked_iota == first                                 # (S, TN)
            recip = 1.0 / (mn + 1e-8)                                  # (1, TN)
            w = jnp.where(sel, recip, w)
            dd = jnp.where(sel, jnp.float32(jnp.inf), dd)

        norm = jnp.sum(w, axis=0, keepdims=True)           # (1, TN)

        # Weighted gather as one MXU matmul; normalization deferred past it.
        pts2 = pts2_ref[0].astype(jnp.float32)             # (D2, S)
        interp = jnp.dot(pts2, w, preferred_element_type=jnp.float32)  # (D2, TN)
        interp = interp * pl.reciprocal(norm, approx=False)

        # Layer 1:  concat([points1, interp]) @ W1  ==  W1a@p1 + W1b@interp.
        y = jnp.dot(w1b_ref[...].astype(jnp.float32), interp,
                    preferred_element_type=jnp.float32)
        if has_points1:
            y = y + jnp.dot(w1a_ref[...].astype(jnp.float32),
                            p1_ref[0].astype(jnp.float32),
                            preferred_element_type=jnp.float32)
        y = jnp.maximum(y * s1_ref[...] + b1_ref[...], 0.0)   # (H1, TN)

        # Remaining (1x1 conv + folded BN + ReLU) layers chained in VMEM.
        for (w_ref, s_ref, b_ref) in extra:
            y = jnp.dot(w_ref[...].astype(jnp.float32), y,
                        preferred_element_type=jnp.float32)
            y = jnp.maximum(y * s_ref[...] + b_ref[...], 0.0)

        out_ref[0] = y.astype(out_ref.dtype)

    return kernel


# ----------------------------- Tiling helpers --------------------------------

def _physical_vmem_bytes():
    """Best-effort physical VMEM capacity of this chip; None if unknown."""
    try:
        info = pltpu.get_tpu_info()
    except Exception:
        return None
    for attr in ("vmem_capacity_bytes", "vmem_size_bytes", "vmem_bytes",
                 "vmem_capacity", "vmem_size"):
        v = getattr(info, attr, None)
        if isinstance(v, int) and v > 0:
            return v
    return None


def _choose_n_tile(B, N, S, block_rows, phys_vmem):
    """S- and generation-aware N tile: biggest TN whose per-step working set
    fits ~40% of physical VMEM, keeping >= 2 grid iterations when possible."""
    candidates = [t for t in (1024, 512, 256, 128) if N % t == 0]
    if not candidates:
        # N not a multiple of 128: single full-N tile (masked partial stores —
        # a perf-only cost, still correct).
        return N
    budget = (phys_vmem if phys_vmem else 64 * 1024 * 1024) * 2 // 5
    chosen = candidates[-1]
    for t in candidates:
        # ~8 live (S, t) f32 dense temporaries (d/dd/cross/w/iota/masks) plus
        # double-buffered channel blocks and MLP activations.
        est = (8 * S * t + 2 * block_rows * t) * 4
        if est <= budget:
            chosen = t
            break
    # v7x has 2 TensorCores per chip: keep the parallel grid at >= 2 iterations.
    while B * (N // chosen) < 2 and chosen > 128 and N % (chosen // 2) == 0:
        chosen //= 2
    return chosen


# ----------------------------- pallas_call wrapper ----------------------------

def fused_feature_propagation(xyz1, xyz2t, points1, points2, layer_params):
    """xyz1 [B,Cpad,N], xyz2t [B,S,Cpad], points1 [B,D1,N] | None, points2 [B,D2,S]."""
    B, C, N = xyz1.shape
    S = xyz2t.shape[1]
    D2 = points2.shape[1]
    has_p1 = points1 is not None
    D1 = points1.shape[1] if has_p1 else 0
    H_out = layer_params[-1][0].shape[0]
    hidden_max = max(w.shape[0] for (w, _, _) in layer_params)

    phys_vmem = _physical_vmem_bytes()
    block_rows = C + D1 + H_out + hidden_max
    TN = _choose_n_tile(B, N, S, block_rows, phys_vmem)
    k = min(3, S)

    const2d = lambda b, nt: (0, 0)

    inputs = [xyz1, xyz2t, points2]
    in_specs = [
        pl.BlockSpec((1, C, TN), lambda b, nt: (b, 0, nt)),
        pl.BlockSpec((1, S, C), lambda b, nt: (b, 0, 0)),
        pl.BlockSpec((1, D2, S), lambda b, nt: (b, 0, 0)),
    ]
    if has_p1:
        inputs.append(points1)
        in_specs.append(pl.BlockSpec((1, D1, TN), lambda b, nt: (b, 0, nt)))

    w0, s0, sh0 = layer_params[0]
    if has_p1:
        w0a, w0b = w0[:, :D1], w0[:, D1:]
        inputs.append(w0a)
        in_specs.append(pl.BlockSpec(w0a.shape, const2d))
    else:
        w0b = w0
    inputs += [w0b, s0, sh0]
    in_specs += [pl.BlockSpec(w0b.shape, const2d),
                 pl.BlockSpec(s0.shape, const2d),
                 pl.BlockSpec(sh0.shape, const2d)]

    for (wl, sl, shl) in layer_params[1:]:
        inputs += [wl, sl, shl]
        in_specs += [pl.BlockSpec(wl.shape, const2d),
                     pl.BlockSpec(sl.shape, const2d),
                     pl.BlockSpec(shl.shape, const2d)]

    kernel = make_fused_kernel(k, has_p1, len(layer_params) - 1)

    # Advisory cost estimate so XLA schedules surrounding ops around the call.
    mm_flops = 2 * B * N * (C * S + D2 * S
                            + sum(w.shape[0] * w.shape[1]
                                  for (w, _, _) in layer_params))
    bytes_accessed = int(sum(x.size * x.dtype.itemsize for x in inputs)
                         + B * H_out * N * 4)
    cost = pl.CostEstimate(flops=int(mm_flops), transcendentals=0,
                           bytes_accessed=bytes_accessed)

    # Explicit scoped-VMEM limit sized to the generation (~96 MiB on 128-MiB
    # chips, ~48 MiB on v7x): the dense (S, TN) k-NN temporaries blow the
    # 16/32 MiB scoped defaults at realistic S.
    vmem_limit = (int(min(phys_vmem * 3 // 4, 96 * 1024 * 1024))
                  if phys_vmem else None)

    return pl.pallas_call(
        kernel,
        out_shape=jax.ShapeDtypeStruct((B, H_out, N), jnp.float32),
        grid=(B, N // TN),
        in_specs=in_specs,
        out_specs=pl.BlockSpec((1, H_out, TN), lambda b, nt: (b, 0, nt)),
        compiler_params=pltpu.CompilerParams(
            dimension_semantics=("parallel", "parallel"),
            vmem_limit_bytes=vmem_limit),
        cost_estimate=cost,
    )(*inputs)


# ----------------------------- Module wrapper --------------------------------

@jax.jit
def feature_propagation(xyz1, xyz2, points1, points2, layer_params):
    """
    xyz1   : [B, 3, N]   xyz2   : [B, 3, S]
    points1: [B, D1, N]  points2: [B, D2, S]
    returns: [B, mlp[-1], N]   (NCW throughout, matching the PyTorch module)
    """
    B, C, N = xyz1.shape
    S = xyz2.shape[2]
    if S == 1:
        # TODO(synk): S==1 "repeat" branch kept in plain JAX glue (rare path).
        interp = jnp.broadcast_to(points2, (B, points2.shape[1], N))
        feats = (jnp.concatenate([points1, interp], axis=1)
                 if points1 is not None else interp)
        for (w, scale, shift) in layer_params:
            feats = jnp.maximum(
                jnp.einsum("oi,bin->bon", w, feats) * scale[None] + shift[None],
                0.0)
        return feats
    # Zero-pad the coordinate channel dim 3 -> 8 so the in-kernel distance
    # matmul gets a clean contraction dim (zero padding is inert for both the
    # squared norms and the dot product).
    if C < _CPAD:
        pad = _CPAD - C
        xyz1 = jnp.pad(xyz1, ((0, 0), (0, pad), (0, 0)))
        xyz2 = jnp.pad(xyz2, ((0, 0), (0, pad), (0, 0)))
    xyz2t = jnp.transpose(xyz2, (0, 2, 1))   # tiny [B, S, Cpad] — only transpose
    return fused_feature_propagation(xyz1, xyz2t, points1, points2, layer_params)


def init_params(key, in_channel, mlp):
    """Deterministic parameters for Conv1d(k=1) + BatchNorm1d (eval) layers."""
    params = []
    last = in_channel
    for out_c in mlp:
        key, k1, k2, k3, k4, k5, k6 = jax.random.split(key, 7)
        conv_w = jax.random.normal(k1, (out_c, last), jnp.float32) * 0.1
        conv_b = jax.random.normal(k2, (out_c,), jnp.float32) * 0.1
        gamma = 1.0 + 0.1 * jax.random.normal(k3, (out_c,), jnp.float32)
        beta = 0.1 * jax.random.normal(k4, (out_c,), jnp.float32)
        run_mean = 0.1 * jax.random.normal(k5, (out_c,), jnp.float32)
        run_var = 1.0 + 0.1 * jnp.abs(jax.random.normal(k6, (out_c,), jnp.float32))
        params.append(dict(conv_w=conv_w, conv_b=conv_b, gamma=gamma,
                           beta=beta, mean=run_mean, var=run_var))
        last = out_c
    return params


def prepare_layer_params(params, eps=1e-5):
    """Fold conv bias + eval BatchNorm into per-channel (scale, shift),
    shaped (Cout, 1) for the channels-first kernel."""
    out = []
    for p in params:
        scale = p["gamma"] / jnp.sqrt(p["var"] + eps)
        shift = (p["conv_b"] - p["mean"]) * scale + p["beta"]
        out.append((p["conv_w"], scale[:, None], shift[:, None]))
    return tuple(out)


# ----------------------------- Pure-JAX reference ----------------------------

def reference_forward(xyz1, xyz2, points1, points2, params, eps=1e-5):
    x1 = jnp.transpose(xyz1, (0, 2, 1))
    x2 = jnp.transpose(xyz2, (0, 2, 1))
    p2 = jnp.transpose(points2, (0, 2, 1))
    d = (-2.0 * jnp.einsum("bnc,bsc->bns", x1, x2)
         + jnp.sum(x1 ** 2, -1)[:, :, None]
         + jnp.sum(x2 ** 2, -1)[:, None, :])
    idx = jnp.argsort(d, axis=-1)[:, :, :3]
    dists = jnp.take_along_axis(d, idx, axis=-1)
    recip = 1.0 / (dists + 1e-8)
    weight = recip / jnp.sum(recip, -1, keepdims=True)
    gathered = jax.vmap(lambda p, i: p[i])(p2, idx)            # [B, N, 3, D2]
    interp = jnp.sum(gathered * weight[..., None], axis=2)     # [B, N, D2]
    p1 = jnp.transpose(points1, (0, 2, 1))
    feats = jnp.concatenate([p1, interp], axis=-1)
    for p in params:
        y = feats @ p["conv_w"].T + p["conv_b"]
        y = (y - p["mean"]) / jnp.sqrt(p["var"] + eps) * p["gamma"] + p["beta"]
        feats = jnp.maximum(y, 0.0)
    return jnp.transpose(feats, (0, 2, 1))


# ----------------------------- Main ------------------------------------------

if __name__ == "__main__":
    key = jax.random.PRNGKey(0)
    B, C, N, S = 2, 3, 16, 8
    D1, D2 = 4, 6
    in_channel = D1 + D2
    mlp = [32, 16]

    k1, k2, k3, k4, kp = jax.random.split(key, 5)
    xyz1 = jax.random.normal(k1, (B, C, N), jnp.float32)
    xyz2 = jax.random.normal(k2, (B, C, S), jnp.float32)
    points1 = jax.random.normal(k3, (B, D1, N), jnp.float32)
    points2 = jax.random.normal(k4, (B, D2, S), jnp.float32)

    params = init_params(kp, in_channel, mlp)
    layer_params = prepare_layer_params(params)

    out = feature_propagation(xyz1, xyz2, points1, points2, layer_params)
    out = jax.block_until_ready(out)

    ref = reference_forward(xyz1, xyz2, points1, points2, params)
    assert out.shape == (B, mlp[-1], N), out.shape
    max_err = float(jnp.max(jnp.abs(out - ref)))
    assert jnp.allclose(out, ref, rtol=1e-4, atol=1e-4), max_err
    print("KERNEL_OK")
</pallas_src>

<mosaic_0001>
module attributes {stable_mosaic.version = 11 : i64} {
  func.func @kernel(%arg0: i32, %arg1: i32, %arg2: memref<1x8x16xf32, #tpu.memory_space<vmem>>, %arg3: memref<1x8x8xf32, #tpu.memory_space<vmem>>, %arg4: memref<1x6x8xf32, #tpu.memory_space<vmem>>, %arg5: memref<1x4x16xf32, #tpu.memory_space<vmem>>, %arg6: memref<32x4xf32, #tpu.memory_space<vmem>>, %arg7: memref<32x6xf32, #tpu.memory_space<vmem>>, %arg8: memref<32x1xf32, #tpu.memory_space<vmem>>, %arg9: memref<32x1xf32, #tpu.memory_space<vmem>>, %arg10: memref<16x32xf32, #tpu.memory_space<vmem>>, %arg11: memref<16x1xf32, #tpu.memory_space<vmem>>, %arg12: memref<16x1xf32, #tpu.memory_space<vmem>>, %arg13: memref<1x16x16xf32, #tpu.memory_space<vmem>>) attributes {dimension_semantics = [#tpu.dimension_semantics<parallel>, #tpu.dimension_semantics<parallel>], iteration_bounds = array<i64: 2, 1>, scalar_prefetch = 0 : i64, scratch_operands = 0 : i64, tpu.core_type = #tpu.core_type<tc>, window_params = [{transform_indices = @transform_0, window_bounds = array<i64: 1, 8, 16>}, {transform_indices = @transform_1, window_bounds = array<i64: 1, 8, 8>}, {transform_indices = @transform_2, window_bounds = array<i64: 1, 6, 8>}, {transform_indices = @transform_3, window_bounds = array<i64: 1, 4, 16>}, {pipeline_mode = #tpu.pipeline_mode<synchronous>, transform_indices = @transform_4, window_bounds = array<i64: 32, 4>}, {pipeline_mode = #tpu.pipeline_mode<synchronous>, transform_indices = @transform_5, window_bounds = array<i64: 32, 6>}, {pipeline_mode = #tpu.pipeline_mode<synchronous>, transform_indices = @transform_6, window_bounds = array<i64: 32, 1>}, {pipeline_mode = #tpu.pipeline_mode<synchronous>, transform_indices = @transform_7, window_bounds = array<i64: 32, 1>}, {pipeline_mode = #tpu.pipeline_mode<synchronous>, transform_indices = @transform_8, window_bounds = array<i64: 16, 32>}, {pipeline_mode = #tpu.pipeline_mode<synchronous>, transform_indices = @transform_9, window_bounds = array<i64: 16, 1>}, {pipeline_mode = #tpu.pipeline_mode<synchronous>, transform_indices = @transform_10, window_bounds = array<i64: 16, 1>}, {transform_indices = @transform_11, window_bounds = array<i64: 1, 16, 16>}]} {
    %c0 = arith.constant 0 : index
    %c0_0 = arith.constant 0 : index
    %c0_1 = arith.constant 0 : index
    %0 = vector.load %arg2[%c0, %c0_0, %c0_1] : memref<1x8x16xf32, #tpu.memory_space<vmem>>, vector<1x8x16xf32>
    %1 = vector.shape_cast %0 : vector<1x8x16xf32> to vector<8x16xf32>
    %c0_2 = arith.constant 0 : index
    %c0_3 = arith.constant 0 : index
    %c0_4 = arith.constant 0 : index
    %2 = vector.load %arg3[%c0_2, %c0_3, %c0_4] : memref<1x8x8xf32, #tpu.memory_space<vmem>>, vector<1x8x8xf32>
    %3 = vector.shape_cast %2 : vector<1x8x8xf32> to vector<8x8xf32>
    %cst = arith.constant dense<0.000000e+00> : vector<8x16xf32>
    %4 = tpu.matmul %3, %1, %cst {dimension_numbers = #tpu.dot_dimension_numbers<[1], [0], [0], [1], [0, 0, 1, 1], [], []>} : vector<8x8xf32>, vector<8x16xf32>, vector<8x16xf32> -> vector<8x16xf32>
    %5 = arith.mulf %1, %1 : vector<8x16xf32>
    %cst_5 = arith.constant dense<0.000000e+00> : vector<16xf32>
    %6 = vector.multi_reduction <add>, %5, %cst_5 [0] : vector<8x16xf32> to vector<16xf32>
    %7 = vector.shape_cast %6 : vector<16xf32> to vector<1x16xf32>
    %8 = arith.mulf %3, %3 : vector<8x8xf32>
    %cst_6 = arith.constant dense<0.000000e+00> : vector<8xf32>
    %9 = vector.multi_reduction <add>, %8, %cst_6 [1] : vector<8x8xf32> to vector<8xf32>
    %10 = vector.shape_cast %9 : vector<8xf32> to vector<8x1xf32>
    %11 = vector.broadcast %7 : vector<1x16xf32> to vector<8x16xf32>
    %12 = vector.broadcast %10 : vector<8x1xf32> to vector<8x16xf32>
    %13 = arith.addf %11, %12 : vector<8x16xf32>
    %cst_7 = arith.constant 2.000000e+00 : f32
    %14 = vector.broadcast %cst_7 : f32 to vector<8x16xf32>
    %15 = arith.mulf %14, %4 : vector<8x16xf32>
    %16 = arith.subf %13, %15 : vector<8x16xf32>
    %17 = tpu.iota {dimensions = array<i32: 0>} : vector<8x16xi32>
    %cst_8 = arith.constant 0.000000e+00 : f32
    %18 = vector.broadcast %cst_8 : f32 to vector<8x16xf32>
    %cst_9 = arith.constant dense<0x7F800000> : vector<16xf32>
    %19 = vector.multi_reduction <minimumf>, %16, %cst_9 [0] : vector<8x16xf32> to vector<16xf32>
    %20 = vector.shape_cast %19 : vector<16xf32> to vector<1x16xf32>
    %21 = vector.broadcast %20 : vector<1x16xf32> to vector<8x16xf32>
    %22 = arith.cmpf oeq, %16, %21 : vector<8x16xf32>
    %c8_i32 = arith.constant 8 : i32
    %23 = vector.broadcast %c8_i32 : i32 to vector<8x16xi32>
    %24 = arith.select %22, %17, %23 : vector<8x16xi1>, vector<8x16xi32>
    %cst_10 = arith.constant dense<2147483647> : vector<16xi32>
    %25 = vector.multi_reduction <minsi>, %24, %cst_10 [0] : vector<8x16xi32> to vector<16xi32>
    %26 = vector.shape_cast %25 : vector<16xi32> to vector<1x16xi32>
    %27 = vector.broadcast %26 : vector<1x16xi32> to vector<8x16xi32>
    %28 = arith.cmpi eq, %24, %27 : vector<8x16xi32>
    %cst_11 = arith.constant 9.99999993E-9 : f32
    %29 = vector.broadcast %cst_11 : f32 to vector<1x16xf32>
    %30 = arith.addf %20, %29 : vector<1x16xf32>
    %cst_12 = arith.constant 1.000000e+00 : f32
    %31 = vector.broadcast %cst_12 : f32 to vector<1x16xf32>
    %32 = arith.divf %31, %30 : vector<1x16xf32>
    %33 = vector.shape_cast %32 : vector<1x16xf32> to vector<1x16xf32>
    %34 = vector.broadcast %33 : vector<1x16xf32> to vector<8x16xf32>
    %35 = arith.select %28, %34, %18 : vector<8x16xi1>, vector<8x16xf32>
    %cst_13 = arith.constant 0x7F800000 : f32
    %36 = vector.broadcast %cst_13 : f32 to vector<8x16xf32>
    %37 = arith.select %28, %36, %16 : vector<8x16xi1>, vector<8x16xf32>
    %cst_14 = arith.constant dense<0x7F800000> : vector<16xf32>
    %38 = vector.multi_reduction <minimumf>, %37, %cst_14 [0] : vector<8x16xf32> to vector<16xf32>
    %39 = vector.shape_cast %38 : vector<16xf32> to vector<1x16xf32>
    %40 = vector.broadcast %39 : vector<1x16xf32> to vector<8x16xf32>
    %41 = arith.cmpf oeq, %37, %40 : vector<8x16xf32>
    %c8_i32_15 = arith.constant 8 : i32
    %42 = vector.broadcast %c8_i32_15 : i32 to vector<8x16xi32>
    %43 = arith.select %41, %17, %42 : vector<8x16xi1>, vector<8x16xi32>
    %cst_16 = arith.constant dense<2147483647> : vector<16xi32>
    %44 = vector.multi_reduction <minsi>, %43, %cst_16 [0] : vector<8x16xi32> to vector<16xi32>
    %45 = vector.shape_cast %44 : vector<16xi32> to vector<1x16xi32>
    %46 = vector.broadcast %45 : vector<1x16xi32> to vector<8x16xi32>
    %47 = arith.cmpi eq, %43, %46 : vector<8x16xi32>
    %cst_17 = arith.constant 9.99999993E-9 : f32
    %48 = vector.broadcast %cst_17 : f32 to vector<1x16xf32>
    %49 = arith.addf %39, %48 : vector<1x16xf32>
    %cst_18 = arith.constant 1.000000e+00 : f32
    %50 = vector.broadcast %cst_18 : f32 to vector<1x16xf32>
    %51 = arith.divf %50, %49 : vector<1x16xf32>
    %52 = vector.shape_cast %51 : vector<1x16xf32> to vector<1x16xf32>
    %53 = vector.broadcast %52 : vector<1x16xf32> to vector<8x16xf32>
    %54 = arith.select %47, %53, %35 : vector<8x16xi1>, vector<8x16xf32>
    %cst_19 = arith.constant 0x7F800000 : f32
    %55 = vector.broadcast %cst_19 : f32 to vector<8x16xf32>
    %56 = arith.select %47, %55, %37 : vector<8x16xi1>, vector<8x16xf32>
    %cst_20 = arith.constant dense<0x7F800000> : vector<16xf32>
    %57 = vector.multi_reduction <minimumf>, %56, %cst_20 [0] : vector<8x16xf32> to vector<16xf32>
    %58 = vector.shape_cast %57 : vector<16xf32> to vector<1x16xf32>
    %59 = vector.broadcast %58 : vector<1x16xf32> to vector<8x16xf32>
    %60 = arith.cmpf oeq, %56, %59 : vector<8x16xf32>
    %c8_i32_21 = arith.constant 8 : i32
    %61 = vector.broadcast %c8_i32_21 : i32 to vector<8x16xi32>
    %62 = arith.select %60, %17, %61 : vector<8x16xi1>, vector<8x16xi32>
    %cst_22 = arith.constant dense<2147483647> : vector<16xi32>
    %63 = vector.multi_reduction <minsi>, %62, %cst_22 [0] : vector<8x16xi32> to vector<16xi32>
    %64 = vector.shape_cast %63 : vector<16xi32> to vector<1x16xi32>
    %65 = vector.broadcast %64 : vector<1x16xi32> to vector<8x16xi32>
    %66 = arith.cmpi eq, %62, %65 : vector<8x16xi32>
    %cst_23 = arith.constant 9.99999993E-9 : f32
    %67 = vector.broadcast %cst_23 : f32 to vector<1x16xf32>
    %68 = arith.addf %58, %67 : vector<1x16xf32>
    %cst_24 = arith.constant 1.000000e+00 : f32
    %69 = vector.broadcast %cst_24 : f32 to vector<1x16xf32>
    %70 = arith.divf %69, %68 : vector<1x16xf32>
    %71 = vector.shape_cast %70 : vector<1x16xf32> to vector<1x16xf32>
    %72 = vector.broadcast %71 : vector<1x16xf32> to vector<8x16xf32>
    %73 = arith.select %66, %72, %54 : vector<8x16xi1>, vector<8x16xf32>
    %cst_25 = arith.constant dense<0.000000e+00> : vector<16xf32>
    %74 = vector.multi_reduction <add>, %73, %cst_25 [0] : vector<8x16xf32> to vector<16xf32>
    %75 = vector.shape_cast %74 : vector<16xf32> to vector<1x16xf32>
    %c0_26 = arith.constant 0 : index
    %c0_27 = arith.constant 0 : index
    %c0_28 = arith.constant 0 : index
    %76 = vector.load %arg4[%c0_26, %c0_27, %c0_28] : memref<1x6x8xf32, #tpu.memory_space<vmem>>, vector<1x6x8xf32>
    %77 = vector.shape_cast %76 : vector<1x6x8xf32> to vector<6x8xf32>
    %cst_29 = arith.constant dense<0.000000e+00> : vector<6x16xf32>
    %78 = tpu.matmul %77, %73, %cst_29 {dimension_numbers = #tpu.dot_dimension_numbers<[1], [0], [0], [1], [0, 0, 1, 1], [], []>} : vector<6x8xf32>, vector<8x16xf32>, vector<6x16xf32> -> vector<6x16xf32>
    %79 = tpu.reciprocal %75 : vector<1x16xf32> -> vector<1x16xf32>
    %80 = vector.broadcast %79 : vector<1x16xf32> to vector<6x16xf32>
    %81 = arith.mulf %78, %80 : vector<6x16xf32>
    %c0_30 = arith.constant 0 : index
    %c0_31 = arith.constant 0 : index
    %82 = vector.load %arg7[%c0_30, %c0_31] : memref<32x6xf32, #tpu.memory_space<vmem>>, vector<32x6xf32>
    %cst_32 = arith.constant dense<0.000000e+00> : vector<32x16xf32>
    %83 = tpu.matmul %82, %81, %cst_32 {dimension_numbers = #tpu.dot_dimension_numbers<[1], [0], [0], [1], [0, 0, 1, 1], [], []>} : vector<32x6xf32>, vector<6x16xf32>, vector<32x16xf32> -> vector<32x16xf32>
    %c0_33 = arith.constant 0 : index
    %c0_34 = arith.constant 0 : index
    %84 = vector.load %arg6[%c0_33, %c0_34] : memref<32x4xf32, #tpu.memory_space<vmem>>, vector<32x4xf32>
    %c0_35 = arith.constant 0 : index
    %c0_36 = arith.constant 0 : index
    %c0_37 = arith.constant 0 : index
    %85 = vector.load %arg5[%c0_35, %c0_36, %c0_37] : memref<1x4x16xf32, #tpu.memory_space<vmem>>, vector<1x4x16xf32>
    %86 = vector.shape_cast %85 : vector<1x4x16xf32> to vector<4x16xf32>
    %cst_38 = arith.constant dense<0.000000e+00> : vector<32x16xf32>
    %87 = tpu.matmul %84, %86, %cst_38 {dimension_numbers = #tpu.dot_dimension_numbers<[1], [0], [0], [1], [0, 0, 1, 1], [], []>} : vector<32x4xf32>, vector<4x16xf32>, vector<32x16xf32> -> vector<32x16xf32>
    %88 = arith.addf %83, %87 : vector<32x16xf32>
    %c0_39 = arith.constant 0 : index
    %c0_40 = arith.constant 0 : index
    %89 = vector.load %arg8[%c0_39, %c0_40] : memref<32x1xf32, #tpu.memory_space<vmem>>, vector<32x1xf32>
    %90 = vector.broadcast %89 : vector<32x1xf32> to vector<32x16xf32>
    %91 = arith.mulf %88, %90 : vector<32x16xf32>
    %c0_41 = arith.constant 0 : index
    %c0_42 = arith.constant 0 : index
    %92 = vector.load %arg9[%c0_41, %c0_42] : memref<32x1xf32, #tpu.memory_space<vmem>>, vector<32x1xf32>
    %93 = vector.broadcast %92 : vector<32x1xf32> to vector<32x16xf32>
    %94 = arith.addf %91, %93 : vector<32x16xf32>
    %cst_43 = arith.constant 0.000000e+00 : f32
    %95 = vector.broadcast %cst_43 : f32 to vector<32x16xf32>
    %96 = arith.maximumf %94, %95 : vector<32x16xf32>
    %c0_44 = arith.constant 0 : index
    %c0_45 = arith.constant 0 : index
    %97 = vector.load %arg10[%c0_44, %c0_45] : memref<16x32xf32, #tpu.memory_space<vmem>>, vector<16x32xf32>
    %cst_46 = arith.constant dense<0.000000e+00> : vector<16x16xf32>
    %98 = tpu.matmul %97, %96, %cst_46 {dimension_numbers = #tpu.dot_dimension_numbers<[1], [0], [0], [1], [0, 0, 1, 1], [], []>} : vector<16x32xf32>, vector<32x16xf32>, vector<16x16xf32> -> vector<16x16xf32>
    %c0_47 = arith.constant 0 : index
    %c0_48 = arith.constant 0 : index
    %99 = vector.load %arg11[%c0_47, %c0_48] : memref<16x1xf32, #tpu.memory_space<vmem>>, vector<16x1xf32>
    %100 = vector.broadcast %99 : vector<16x1xf32> to vector<16x16xf32>
    %101 = arith.mulf %98, %100 : vector<16x16xf32>
    %c0_49 = arith.constant 0 : index
    %c0_50 = arith.constant 0 : index
    %102 = vector.load %arg12[%c0_49, %c0_50] : memref<16x1xf32, #tpu.memory_space<vmem>>, vector<16x1xf32>
    %103 = vector.broadcast %102 : vector<16x1xf32> to vector<16x16xf32>
    %104 = arith.addf %101, %103 : vector<16x16xf32>
    %cst_51 = arith.constant 0.000000e+00 : f32
    %105 = vector.broadcast %cst_51 : f32 to vector<16x16xf32>
    %106 = arith.maximumf %104, %105 : vector<16x16xf32>
    %c0_52 = arith.constant 0 : index
    %c0_53 = arith.constant 0 : index
    %c0_54 = arith.constant 0 : index
    %107 = vector.load %arg13[%c0_52, %c0_53, %c0_54] : memref<1x16x16xf32, #tpu.memory_space<vmem>>, vector<1x16x16xf32>
    %108 = vector.shape_cast %107 : vector<1x16x16xf32> to vector<16x16xf32>
    %109 = vector.shape_cast %106 : vector<16x16xf32> to vector<1x16x16xf32>
    tpu.vector_store %arg13[%c0_52, %c0_53, %c0_54], %109 {strides = array<i32>} : memref<1x16x16xf32, #tpu.memory_space<vmem>>, vector<1x16x16xf32>,
    return
  }
  func.func @transform_0(%arg0: i32, %arg1: i32) -> (i32, i32, i32) {
    %c0_i32 = arith.constant 0 : i32
    %c0_i32_0 = arith.constant 0 : i32
    return %arg0, %c0_i32, %arg1 : i32, i32, i32
  }
  func.func @transform_1(%arg0: i32, %arg1: i32) -> (i32, i32, i32) {
    %c0_i32 = arith.constant 0 : i32
    %c0_i32_0 = arith.constant 0 : i32
    %c0_i32_1 = arith.constant 0 : i32
    return %arg0, %c0_i32, %c0_i32_0 : i32, i32, i32
  }
  func.func @transform_2(%arg0: i32, %arg1: i32) -> (i32, i32, i32) {
    %c0_i32 = arith.constant 0 : i32
    %c0_i32_0 = arith.constant 0 : i32
    %c0_i32_1 = arith.constant 0 : i32
    return %arg0, %c0_i32, %c0_i32_0 : i32, i32, i32
  }
  func.func @transform_3(%arg0: i32, %arg1: i32) -> (i32, i32, i32) {
    %c0_i32 = arith.constant 0 : i32
    %c0_i32_0 = arith.constant 0 : i32
    return %arg0, %c0_i32, %arg1 : i32, i32, i32
  }
  func.func @transform_4(%arg0: i32, %arg1: i32) -> (i32, i32) {
    %c0_i32 = arith.constant 0 : i32
    %c0_i32_0 = arith.constant 0 : i32
    %c0_i32_1 = arith.constant 0 : i32
    return %c0_i32, %c0_i32_0 : i32, i32
  }
  func.func @transform_5(%arg0: i32, %arg1: i32) -> (i32, i32) {
    %c0_i32 = arith.constant 0 : i32
    %c0_i32_0 = arith.constant 0 : i32
    %c0_i32_1 = arith.constant 0 : i32
    return %c0_i32, %c0_i32_0 : i32, i32
  }
  func.func @transform_6(%arg0: i32, %arg1: i32) -> (i32, i32) {
    %c0_i32 = arith.constant 0 : i32
    %c0_i32_0 = arith.constant 0 : i32
    %c0_i32_1 = arith.constant 0 : i32
    return %c0_i32, %c0_i32_0 : i32, i32
  }
  func.func @transform_7(%arg0: i32, %arg1: i32) -> (i32, i32) {
    %c0_i32 = arith.constant 0 : i32
    %c0_i32_0 = arith.constant 0 : i32
    %c0_i32_1 = arith.constant 0 : i32
    return %c0_i32, %c0_i32_0 : i32, i32
  }
  func.func @transform_8(%arg0: i32, %arg1: i32) -> (i32, i32) {
    %c0_i32 = arith.constant 0 : i32
    %c0_i32_0 = arith.constant 0 : i32
    %c0_i32_1 = arith.constant 0 : i32
    return %c0_i32, %c0_i32_0 : i32, i32
  }
  func.func @transform_9(%arg0: i32, %arg1: i32) -> (i32, i32) {
    %c0_i32 = arith.constant 0 : i32
    %c0_i32_0 = arith.constant 0 : i32
    %c0_i32_1 = arith.constant 0 : i32
    return %c0_i32, %c0_i32_0 : i32, i32
  }
  func.func @transform_10(%arg0: i32, %arg1: i32) -> (i32, i32) {
    %c0_i32 = arith.constant 0 : i32
    %c0_i32_0 = arith.constant 0 : i32
    %c0_i32_1 = arith.constant 0 : i32
    return %c0_i32, %c0_i32_0 : i32, i32
  }
  func.func @transform_11(%arg0: i32, %arg1: i32) -> (i32, i32, i32) {
    %c0_i32 = arith.constant 0 : i32
    %c0_i32_0 = arith.constant 0 : i32
    return %arg0, %c0_i32, %arg1 : i32, i32, i32
  }
}

</mosaic_0001>

<bundles_post_ra>
// kernel: feature_propagation.1
= control target key start
LH: loop header
LB: loop body
LE: loop exit
PB: predicated region body
PF: predicated region fallthrough
CT: control target
= control target key end

     0   :  { %s1536_s0 = inlined_call_operand.vmem [shape: f32[2,8,16], index: 0, kind: input, shape index: {}]   ;;  %s1537_s1 = inlined_call_operand.vmem [shape: f32[2,8,8], index: 1, kind: input, shape index: {}]   ;;  %s1538_s2 = inlined_call_operand.vmem [shape: f32[2,6,8], index: 2, kind: input, shape index: {}]   ;;  %s1539_s3 = inlined_call_operand.vmem [shape: f32[2,4,16], index: 3, kind: input, shape index: {}]   ;;  %s1540_s4 = inlined_call_operand.vmem [shape: f32[32,4], index: 4, kind: input, shape index: {}]   ;;  %s1541_s5 = inlined_call_operand.vmem [shape: f32[32,6], index: 5, kind: input, shape index: {}]   ;;  %s1542_s6 = inlined_call_operand.vmem [shape: f32[32,1], index: 6, kind: input, shape index: {}]   ;;  %s1543_s7 = inlined_call_operand.vmem [shape: f32[32,1], index: 7, kind: input, shape index: {}]   ;;  %s1544_s8 = inlined_call_operand.vmem [shape: f32[16,32], index: 8, kind: input, shape index: {}]   ;;  %s1545_s9 = inlined_call_operand.vmem [shape: f32[16,1], index: 9, kind: input, shape index: {}]   ;;  %s1546_s10 = inlined_call_operand.vmem [shape: f32[16,1], index: 10, kind: input, shape index: {}]   ;;  %s1547_s11 = inlined_call_operand.hbm [shape: f32[2,16,16], index: 11, kind: output, shape index: {}]  }
   0x1   :  { %1548 = sst [smem:[#allocation5_spill]] %s1536_s0 }
   0x2   :  { %1549 = sst [smem:[#allocation6_spill]] %s1537_s1 }
   0x3   :  { %16 = vsyncpa [#allocation3], 0 }
   0x4   :  { %18 = vsyncpa [#allocation3 + $0x1], 0  ;;  %s1272_s17 = smov 0   ;;  %s1274_s18 = smov 0  }
   0x5   :  { %s1276_s19 = smov 0   ;;  %s1278_s20 = smov 0  }
   0x6   :  { %s1280_s21 = smov 0   ;;  %s1282_s22 = smov 0  }
   0x7 LB: > { %s1028_s23 = sadd.s32 4294967295, %s1207_s22   ;;  %s1029_s24 = sadd.s32 4294967294, %s1207_s22   ;;  %s1207_s22 = sphi %s1282_s22, %s24_s22   ;;  %s1203_s21 = sphi %s1280_s21, %s1560_s21   ;;  %s1199_s20 = sphi %s1278_s20, %s1559_s20   ;;  %s1195_s19 = sphi %s1276_s19, %s1558_s19   ;;  %s1191_s18 = sphi %s1274_s18, %s1557_s18   ;;  %s1187_s17 = sphi %s1272_s17, %s1556_s17  }
   0x8   : > { %s36_s25 = sadd.s32 1, %s1203_s21  ;;  %s300_s26 = sadd.s32 1, %s1195_s19 }
   0x9   : > { %p38_p0 = scmp.ge.s32.totalorder %s36_s25, 2  ;;  %p310_p1 = scmp.ne.s32.totalorder %s1195_s19, %s1191_s18 }
   0xa   : > { %p311_p2 = scmp.eq.s32.totalorder %s1028_s23, 1  ;;  %p316_p3 = scmp.ne.s32.totalorder %s1191_s18, %s1187_s17 }
   0xb   : > { %s1562_s25 = smov (%p38_p0, %s36_s25), 0  ;;  %p317_p5 = scmp.eq.s32.totalorder %s1029_s24, 1 }
   0xc   : > { %p1312_p4 = por %p311_p2, %p310_p1  ;;  %s295_s28 = ssub.s32 %s1203_s21, %s1562_s25 }
   0xd   : > { %p1032_p6 = scmp.ge.s32.totalorder %s1207_s22, 1  ;;  %p298_p7 = scmp.eq.s32.totalorder %s295_s28, 0 }
   0xe   : > { %p1319_p8 = por %p317_p5, %p316_p3  ;;  %p390_p9 = scmp.lt.s32.totalorder %s1207_s22, 3 }
   0xf   : > { %s1325_s30 = scalar_select %p298_p7, %s1195_s19, %s300_s26  }
  0x10   : > { %p391_p10 = pnand %p1032_p6, %p390_p9 }
  0x11   : > { %p447_p11 = scmp.lt.s32.totalorder (!%p391_p10), %s1199_s20, 1  ;;  %s1552_s0 = sld [smem:[#allocation5_spill]] (!%p391_p10) }
  0x12   : > { %394 = sbr.rel (%p391_p10) target bundleno = 689 (0x2b1), region = 64  ;;  %s1553_s1 = sld [smem:[#allocation6_spill]] (!%p391_p10) }
  0x17   : > { %s1329_s12 = scalar_select %p447_p11, %s1199_s20, 1  ;;  %vm471_vm0 = vcmask 64512   ;;  %vm496_vm1 = vcmask 130048   ;;  %v511_v21 = vlaneseq  ;;  %vm694_vm13 = vcmask 1043456  }
  0x19   : > { %s1332_s13 = sshll.u32 %s1329_s12, 3  ;;  %v512_v24 = vshrl.u32 %v511_v21, 7  ;;  %s1037_s28 = sshll.u32 %s1329_s12, 2 }
  0x1a   : > { %s453_s16 = scalar_lea.vmem %s1552_s0, %s1332_s13  ;;  %s457_s26 = scalar_lea.vmem %s1553_s1, %s1332_s13 }
  0x1b   : > { %v469_v0 = vld [vmem:[%s453_s16] sm:$0xff]  ;;  %s468_s16 = scalar_lea.vmem %s1539_s3, %s1037_s28  ;;  %s461_s15 = scalar_lea.vmem %s1538_s2, %s1332_s13 }
  0x1c   : > { %v470_v1 = vld [vmem:[%s457_s26] sm:$0xff]  ;;  %490 = vmatpush.msra.mxu0 %v469_v0  ;;  %v495_v4 = vmul.f32 %v469_v0, %v469_v0  ;;  %s444_s12 = sand.u32 1, %s1191_s18   ;;  %s1057_s28 = sshll.u32 %s1199_s20, 4 }
  0x1d   : > { %v504_v2 = vmul.f32 %v470_v1, %v470_v1  ;;  %1038 = vmatmul.msk.f32.vlgmr.msra.gmra.mxu0 %vm471_vm0, %v470_v1  ;;  %s1033_s26 = sshll.u32 %s444_s12, 4  ;;  %s898_s20 = scalar_lea.sflag [#allocation3], %s444_s12 }
  0x1e   : > { %v497_v5 = vsel %vm496_vm1, %v495_v4, 0.0  ;;  %v775_v4 = vld [vmem:[%s1542_s6 + $0x10] sm:$0xff]  ;;  %s446_s23 = scalar_lea.vmem [#allocation2], %s1033_s26 }
  0x1f   : > { %v505_v3 = vsel %vm471_vm0, %v504_v2, 0.0  ;;  %v498_v6 = vrot.slane %v497_v5, 4  ;;  %s911_s13 = sshll.u32 %s446_s23, 4  ;;  %s912_s13 = int_to_ptr.vmem [resolvable:$true] %s911_s13 }
  0x20   : > { %506 = vadd.xlane.f32.xlu0 %v505_v3 }
  0x21   : > { %v499_v7 = vadd.f32 %v498_v6, %v497_v5  ;;  %v1209_v6 = vmov 0  }
  0x22   : > { %1119 = vset.pattern.permute.xlu1 %v1209_v6  ;;  %1120 = vset.pattern.permute.xlu2 %v1209_v6 }
  0x23   : > { %v500_v8 = vrot.slane %v499_v7, 2  ;;  %789 = vperm.xlu1 %1119, %v775_v4   ;;  %1118 = vset.pattern.permute.xlu0 %v1209_v6 }
  0x25   : > { %v501_v9 = vadd.f32 %v500_v8, %v499_v7  ;;  %v1395_v7 = vld [vmem:[%s468_s16] sm:$0xf]  ;;  %s910_s16 = scalar_lea.hbm %s1547_s11, %s1057_s28 }
  0x26   : > { %1058 = vmatpush.msk.msra.mxu2 %vm694_vm13, %v1395_v7  ;;  %s913_s24 = sshll.u32 %s910_s16, 4  ;;  %s914_s24 = int_to_ptr.hbm [resolvable:$true] %s913_s24 }
  0x27   : > { %v502_v10 = vrot.slane %v501_v9, 1  ;;  %s1143_s0 = sshra.s32 %s914_s24, 4  ;;  %s1144_s0 = int_to_ptr.hbm [resolvable:$true] %s1143_s0 }
  0x28   : > { %s1145_s14 = scalar_lea.hbm %s1144_s0, 16  ;;  %p1150_p1 = scmp.lt.s32.totalorder %s1144_s0, %s1547_s11 }
  0x29   : > { %v503_v11 = vadd.f32 %v502_v10, %v501_v9  ;;  %p1146_p12 = scmp.ne.s32.totalorder %s1144_s0, %s1145_s14 }
  0x2b   : > { %p1147_p13 = pnand %p1146_p12, %p1312_p4 }
  0x2d   : > { %p1148_p0 = pneg %p1147_p13 }
  0x93   : > { %v507_v12 = vpop.xlane.xlu0 %506 }
  0x94   : > { %v508_v13 = vadd.f32 %v507_v12, %v503_v11 }
  0x9a   : > { %v492_v14 = vpop.f32.mrf.mxu0 }
  0x9b   : > { %v509_v15 = vmul.f32 2.0, %v492_v14 }
  0x9d   : > { %v510_v16 = vsub.f32 %v508_v13, %v509_v15 }
  0x9f   : > { %v513_v17 = vsel %vm496_vm1, %v510_v16, inf }
  0xa0   : > { %v514_v18 = vrot.slane %v513_v17, 4 }
  0xa2   : > { %v515_v19 = vmin.f32 %v513_v17, %v514_v18 }
  0xa4   : > { %v516_v20 = vrot.slane %v515_v19, 2 }
  0xa6   : > { %v517_v22 = vmin.f32 %v515_v19, %v516_v20  ;;  %v804_v19 = vld [vmem:[%s1543_s7 + $0x18] sm:$0xff] }
  0xa7   : > { %822 = vperm.xlu1 %1119, %v804_v19  }
  0xa8   : > { %v518_v23 = vrot.slane %v517_v22, 1 }
  0xaa   : > { %v519_v25 = vmin.f32 %v517_v22, %v518_v23 }
  0xac   : > { %vm520_vm2 = vcmp.eq.f32.partialorder %v510_v16, %v519_v25  ;;  %v1362_v49 = vadd.f32 1e-08, %v519_v25 }
  0xad   : > { %v1346_v26 = vsel %vm520_vm2, %v512_v24, 8 }
  0xae   : > { %v522_v27 = vsel %vm496_vm1, %v1346_v26, 2147483647  ;;  %1121 = vrcp.f32 %v1362_v49  ;;  %v543_v13 = vand.u32 2147483647, %v1362_v49 }
  0xaf   : > { %v523_v28 = vrot.slane %v522_v27, 4 }
  0xb1   : > { %vm524_vm3 = vcmp.lt.s32.totalorder %v522_v27, %v523_v28 }
  0xb2   : > { %v525_v29 = vsel %vm524_vm3, %v522_v27, %v523_v28  ;;  %vm539_vm3 = vweird.f32 %v1362_v49 }
  0xb3   : > { %v526_v30 = vrot.slane %v525_v29, 2 }
  0xb4   : > { %v1376_v56 = vpop.eup %1121 }
  0xb5   : > { %vm527_vm4 = vcmp.lt.s32.totalorder %v525_v29, %v526_v30  ;;  %v535_v60 = vmul.f32 %v1376_v56, %v1362_v49  ;;  %vm540_vm15 = vweird.f32 %v1376_v56 }
  0xb6   : > { %v528_v31 = vsel %vm527_vm4, %v525_v29, %v526_v30 }
  0xb7   : > { %v529_v32 = vrot.slane %v528_v31, 1  ;;  %v536_v0 = vsub.f32 1.0, %v535_v60  ;;  %v679_v60 = vld [vmem:[%s1540_s4 + $0x18] sm:$0xff] }
  0xb9   : > { %vm530_vm5 = vcmp.lt.s32.totalorder %v528_v31, %v529_v32  ;;  %v537_v8 = vmul.f32 %v1376_v56, %v536_v0  ;;  %v776_v0 = vld [vmem:[%s1542_s6 + $0x18] sm:$0xff] }
  0xba   : > { %v1350_v33 = vsel %vm530_vm5, %v528_v31, %v529_v32  ;;  %vm1412_vm5 = vmor %vm539_vm3, %vm540_vm15  ;;  %794 = vperm.xlu0 %1118, %v776_v0  }
  0xbb   : > { %vm532_vm6 = vcmp.eq.s32.totalorder %v1346_v26, %v1350_v33  ;;  %v538_v12 = vadd.f32 %v1376_v56, %v537_v8 }
  0xbc   : > { %v550_v34 = vsel %vm532_vm6, inf, %v510_v16  ;;  %v545_v16 = vand.u32 2147483648, %v1362_v49 }
  0xbd   : > { %v551_v35 = vsel %vm496_vm1, %v550_v34, inf }
  0xbe   : > { %v552_v36 = vrot.slane %v551_v35, 4  ;;  %v546_v28 = vor.u32 1.1754944e-38, %v545_v16  ;;  %v879_v16 = vld [vmem:[%s1546_s10] sm:$0xff] }
  0xc0   : > { %v553_v37 = vmin.f32 %v551_v35, %v552_v36 }
  0xc2   : > { %v554_v38 = vrot.slane %v553_v37, 2 }
  0xc4   : > { %v555_v39 = vmin.f32 %v553_v37, %v554_v38 }
  0xc6   : > { %v556_v40 = vrot.slane %v555_v39, 1 }
  0xc8   : > { %v557_v41 = vmin.f32 %v555_v39, %v556_v40  ;;  %v773_v40 = vld [vmem:[%s1542_s6] sm:$0xff] }
  0xc9   : > { %779 = vperm.xlu1 %1119, %v773_v40  }
  0xca   : > { %vm558_vm7 = vcmp.eq.f32.partialorder %v550_v34, %v557_v41  ;;  %v1364_v50 = vadd.f32 1e-08, %v557_v41 }
  0xcb   : > { %v1358_v42 = vsel %vm558_vm7, %v512_v24, 8 }
  0xcc   : > { %v560_v43 = vsel %vm496_vm1, %v1358_v42, 2147483647  ;;  %1123 = vrcp.f32 %v1364_v50  ;;  %v583_v18 = vand.u32 2147483648, %v1364_v50  ;;  %vm577_vm7 = vweird.f32 %v1364_v50 }
  0xcd   : > { %v561_v44 = vrot.slane %v560_v43, 4  ;;  %v581_v22 = vand.u32 2147483647, %v1364_v50 }
  0xce   : > { %v584_v30 = vor.u32 1.1754944e-38, %v583_v18 }
  0xcf   : > { %vm562_vm8 = vcmp.lt.s32.totalorder %v560_v43, %v561_v44 }
  0xd0   : > { %v563_v45 = vsel %vm562_vm8, %v560_v43, %v561_v44  ;;  %vm544_vm8 = vcmp.eq.f32.partialorder %v543_v13, 8.507059e+37  ;;  %v674_v13 = vld [vmem:[%s1541_s5 + $0x10] sm:$0xff] }
  0xd1   : > { %v564_v46 = vrot.slane %v563_v45, 2 }
  0xd2   : > { %v1378_v58 = vpop.eup %1123 }
  0xd3   : > { %vm565_vm9 = vcmp.lt.s32.totalorder %v563_v45, %v564_v46  ;;  %v573_v61 = vmul.f32 %v1378_v58, %v1364_v50  ;;  %vm578_vm2 = vweird.f32 %v1378_v58 }
  0xd4   : > { %v566_v47 = vsel %vm565_vm9, %v563_v45, %v564_v46  ;;  %vm579_vm9 = vmor %vm577_vm7, %vm578_vm2  ;;  %v633_v46 = vld [vmem:[%s461_s15] sm:$0x3f]  ;;  %vm740_vm7 = vcmask 1045504   ;;  %s1149_s15 = scalar_lea.hbm %s1547_s11, 32 }
  0xd5   : > { %v567_v48 = vrot.slane %v566_v47, 1  ;;  %v574_v1 = vsub.f32 1.0, %v573_v61  ;;  %v774_v61 = vld [vmem:[%s1542_s6 + $0x8] sm:$0xff]  ;;  %p1151_p2 = scmp.lt.s32.totalorder %s1149_s15, %s1145_s14 }
  0xd6   : > { %784 = vperm.xlu2 %1120, %v774_v61  }
  0xd7   : > { %vm568_vm10 = vcmp.lt.s32.totalorder %v566_v47, %v567_v48  ;;  %v575_v10 = vmul.f32 %v1378_v58, %v574_v1  ;;  %p1152_p3 = por %p1151_p2, %p1150_p1 }
  0xd8   : > { %v1366_v51 = vsel %vm568_vm10, %v566_v47, %v567_v48 }
  0xd9   : > { %vm570_vm11 = vcmp.eq.s32.totalorder %v1358_v42, %v1366_v51  ;;  %v576_v17 = vadd.f32 %v1378_v58, %v575_v10  ;;  %v673_v10 = vld [vmem:[%s1541_s5 + $0x8] sm:$0xff]  ;;  %p1153_p5 = pnand %p1152_p3, %p1148_p0 }
  0xda   : > { %v588_v52 = vsel %vm570_vm11, inf, %v550_v34 }
  0xdb   : > { %v589_v53 = vsel %vm496_vm1, %v588_v52, inf  ;;  %v580_v29 = vsel %vm579_vm9, %v1378_v58, %v576_v17  ;;  %v790_v17 = vpop.permute.xlu1 %789  ;;  %vm835_vm9 = vcmask 261120  }
  0xdc   : > { %v590_v54 = vrot.slane %v589_v53, 4 }
  0xde   : > { %v591_v55 = vmin.f32 %v589_v53, %v590_v54  ;;  %v677_v53 = vld [vmem:[%s1540_s4 + $0x8] sm:$0xff]  ;;  %v801_v54 = vld [vmem:[%s1543_s7] sm:$0xff] }
  0xdf   : > { %807 = vperm.xlu1 %1119, %v801_v54  }
  0xe0   : > { %v592_v57 = vrot.slane %v591_v55, 2 }
  0xe2   : > { %v593_v59 = vmin.f32 %v591_v55, %v592_v57  ;;  %v678_v55 = vld [vmem:[%s1540_s4 + $0x10] sm:$0xff]  ;;  %v866_v57 = vld [vmem:[%s1545_s9 + $0x8] sm:$0xff] }
  0xe4   : > { %v594_v62 = vrot.slane %v593_v59, 1 }
  0xe6   : > { %v595_v63 = vmin.f32 %v593_v59, %v594_v62  ;;  %v880_v62 = vld [vmem:[%s1546_s10 + $0x8] sm:$0xff] }
  0xe7   : > { %874 = vperm.xlu1 %1119, %v866_v57  }
  0xe8   : > { %vm596_vm12 = vcmp.eq.f32.partialorder %v588_v52, %v595_v63  ;;  %v609_v2 = vadd.f32 1e-08, %v595_v63  ;;  %v676_v52 = vld [vmem:[%s1540_s4] sm:$0xff] }
  0xe9   : > { %v1388_v3 = vsel %vm596_vm12, %v512_v24, 8  ;;  %v542_v24 = vsel %vm1412_vm5, %v1376_v56, %v538_v12  ;;  %v802_v12 = vld [vmem:[%s1543_s7 + $0x8] sm:$0xff] }
  0xea   : > { %v598_v5 = vsel %vm496_vm1, %v1388_v3, 2147483647  ;;  %1125 = vrcp.f32 %v609_v2  ;;  %v621_v31 = vand.u32 2147483648, %v609_v2  ;;  %v619_v34 = vand.u32 2147483647, %v609_v2 }
  0xeb   : > { %v599_v9 = vrot.slane %v598_v5, 4  ;;  %v547_v35 = vsel %vm544_vm8, %v546_v28, %v542_v24  ;;  %vm615_vm15 = vweird.f32 %v609_v2  ;;  %vm727_vm8 = vcmask 48128  }
  0xec   : > { %v622_v39 = vor.u32 1.1754944e-38, %v621_v31  ;;  %v549_v41 = vsel %vm532_vm6, %v547_v35, 0.0  ;;  %vm620_vm3 = vcmp.eq.f32.partialorder %v619_v34, 8.507059e+37  ;;  %vm681_vm6 = vcmask 31744  }
  0xed   : > { %vm600_vm14 = vcmp.lt.s32.totalorder %v598_v5, %v599_v9  ;;  %1042 = vmatmul.msk.f32.vlgmr.msra.gmra.mxu2 %vm681_vm6, %v677_v53 }
  0xee   : > { %v601_v11 = vsel %vm600_vm14, %v598_v5, %v599_v9  ;;  %vm582_vm14 = vcmp.eq.f32.partialorder %v581_v22, 8.507059e+37 }
  0xef   : > { %v602_v14 = vrot.slane %v601_v11, 2  ;;  %v585_v36 = vsel %vm582_vm14, %v584_v30, %v580_v29  ;;  %888 = vperm.xlu1 %1119, %v880_v62  }
  0xf0   : > { %v1126_v15 = vpop.eup %1125  ;;  %v587_v44 = vsel %vm570_vm11, %v585_v36, %v549_v41 }
  0xf1   : > { %vm603_vm4 = vcmp.lt.s32.totalorder %v601_v11, %v602_v14  ;;  %v611_v20 = vmul.f32 %v1126_v15, %v609_v2  ;;  %vm616_vm12 = vweird.f32 %v1126_v15 }
  0xf2   : > { %v604_v23 = vsel %vm603_vm4, %v601_v11, %v602_v14  ;;  %vm617_vm2 = vmor %vm615_vm15, %vm616_vm12  ;;  %v672_v11 = vld [vmem:[%s1541_s5] sm:$0xff] }
  0xf3   : > { %v605_v25 = vrot.slane %v604_v23, 1  ;;  %v612_v27 = vsub.f32 1.0, %v611_v20  ;;  %v865_v14 = vld [vmem:[%s1545_s9] sm:$0xff] }
  0xf5   : > { %vm606_vm10 = vcmp.lt.s32.totalorder %v604_v23, %v605_v25  ;;  %v613_v32 = vmul.f32 %v1126_v15, %v612_v27  ;;  %1043 = vmatmul.msk.f32.gmra.mxu2 %vm681_vm6, %v678_v55 }
  0xf6   : > { %v607_v37 = vsel %vm606_vm10, %v604_v23, %v605_v25 }
  0xf7   : > { %v614_v38 = vadd.f32 %v1126_v15, %v613_v32  ;;  %vm608_vm4 = vcmp.eq.s32.totalorder %v1388_v3, %v607_v37  ;;  %v803_v3 = vld [vmem:[%s1543_s7 + $0x10] sm:$0xff] }
  0xf8   : > { %817 = vperm.xlu2 %1120, %v803_v3  }
  0xf9   : > { %v618_v43 = vsel %vm617_vm2, %v1126_v15, %v614_v38  ;;  %v675_v15 = vld [vmem:[%s1541_s5 + $0x18] sm:$0xff] }
  0xfa   : > { %v623_v45 = vsel %vm620_vm3, %v622_v39, %v618_v43 }
  0xfb   : > { %v625_v47 = vsel %vm608_vm4, %v623_v45, %v587_v44 }
  0xfc   : > { %652 = vmatpush.msra.mxu1 %v625_v47  ;;  %v626_v26 = vsel %vm496_vm1, %v625_v47, 0.0 }
  0xfd   : > { %1039 = vmatmul.msk.f32.vlgmr.msra.gmra.mxu1 %vm471_vm0, %v633_v46  ;;  %v627_v33 = vrot.slane %v626_v26, 4  ;;  %1044 = vmatmul.msk.f32.gmra.mxu2 %vm681_vm6, %v679_v60 }
  0xfe   : > { %1040 = vmatpush.msk.msrb.mxu1 %vm694_vm13, %v1395_v7 }
  0xff   : > { %v628_v48 = vadd.f32 %v627_v33, %v626_v26 }
 0x100   : > { %812 = vperm.xlu2 %1120, %v802_v12  }
 0x101   : > { %v629_v49 = vrot.slane %v628_v48, 2 }
 0x103   : > { %v630_v50 = vadd.f32 %v629_v49, %v628_v48 }
 0x105   : > { %v631_v42 = vrot.slane %v630_v50, 1  ;;  %1041 = vmatmul.msk.f32.vlgmr.msrb.gmra.mxu1 %vm681_vm6, %v676_v52 }
 0x107   : > { %v632_v51 = vadd.f32 %v631_v42, %v630_v50  ;;  %v833_v50 = vld [vmem:[%s1544_s8] sm:$0xff]  ;;  %v834_v42 = vld [vmem:[%s1544_s8 + $0x8] sm:$0xff] }
 0x108   : > { %869 = vperm.xlu2 %1120, %v865_v14  }
 0x109   : > { %1127 = vrcp.f32 %v632_v51  ;;  %v668_v2 = vand.u32 2147483648, %v632_v51  ;;  %vm662_vm11 = vweird.f32 %v632_v51  ;;  %v666_v4 = vand.u32 2147483647, %v632_v51 }
 0x10b   : > { %v669_v6 = vor.u32 1.1754944e-38, %v668_v2  ;;  %vm667_vm5 = vcmp.eq.f32.partialorder %v666_v4, 8.507059e+37 }
 0x10f   : > { %v1128_v56 = vpop.eup %1127 }
 0x110   : > { %v658_v58 = vmul.f32 %v1128_v56, %v632_v51  ;;  %vm663_vm0 = vweird.f32 %v1128_v56  ;;  %883 = vperm.xlu2 %1120, %v879_v16  }
 0x111   : > { %vm664_vm13 = vmor %vm662_vm11, %vm663_vm0 }
 0x112   : > { %v659_v59 = vsub.f32 1.0, %v658_v58 }
 0x114   : > { %v660_v63 = vmul.f32 %v1128_v56, %v659_v59 }
 0x116   : > { %v661_v1 = vadd.f32 %v1128_v56, %v660_v63 }
 0x118   : > { %v665_v5 = vsel %vm664_vm13, %v1128_v56, %v661_v1 }
 0x119   : > { %v670_v8 = vsel %vm667_vm5, %v669_v6, %v665_v5  ;;  %v823_v21 = vpop.permute.xlu1 %822 }
 0x12c   : > { %v795_v34 = vpop.permute.xlu0 %794 }
 0x130   : > { %v785_v20 = vpop.permute.xlu2 %784 }
 0x13b   : > { %v780_v27 = vpop.permute.xlu1 %779 }
 0x151   : > { %v808_v47 = vpop.permute.xlu1 %807 }
 0x152   : > { %v818_v25 = vpop.permute.xlu2 %817 }
 0x159   : > { %v875_v52 = vpop.permute.xlu1 %874 }
 0x15a   : > { %v813_v44 = vpop.permute.xlu2 %812 }
 0x161   : > { %v889_v60 = vpop.permute.xlu1 %888 }
 0x162   : > { %v870_v51 = vpop.permute.xlu2 %869 }
 0x16a   : > { %v884_v55 = vpop.permute.xlu2 %883 }
 0x170   : > { %v718_v18 = vpop.f32.mrf.mxu2 }
 0x178   : > { %v721_v23 = vpop.f32.mrf.mxu2 }
 0x17a   : > { %v654_v7 = vpop.f32.mrf.mxu1 }
 0x17b   : > { %v671_v9 = vmul.f32 %v670_v8, %v654_v7 }
 0x17d   : > { %1045 = vmatpush.msk.msra.mxu1 %vm740_vm7, %v671_v9  ;;  %1059 = vmatpush.msk.msra.mxu3 %vm740_vm7, %v671_v9 }
 0x17e   : > { %1047 = vmatmul.msk.f32.vlgmr.msra.gmra.mxu3 %vm727_vm8, %v673_v10  ;;  %1046 = vmatmul.msk.f32.vlgmr.msra.gmra.mxu1 %vm727_vm8, %v672_v11 }
 0x180   : > { %v724_v30 = vpop.f32.mrf.mxu2 }
 0x182   : > { %v715_v22 = vpop.f32.mrf.mxu1 }
 0x186   : > { %1048 = vmatmul.msk.f32.gmra.mxu3 %vm727_vm8, %v674_v13 }
 0x18e   : > { %1049 = vmatmul.msk.f32.gmra.mxu3 %vm727_vm8, %v675_v15 }
 0x1fb   : > { %v761_v29 = vpop.f32.mrf.mxu1 }
 0x1fc   : > { %v762_v35 = vadd.f32 %v761_v29, %v715_v22 }
 0x1fe   : > { %v797_v40 = vmul.f32 %v780_v27, %v762_v35 }
 0x200   : > { %v825_v33 = vadd.f32 %v808_v47, %v797_v40 }
 0x201   : > { %v764_v19 = vpop.f32.mrf.mxu3 }
 0x202   : > { %v765_v31 = vadd.f32 %v764_v19, %v718_v18  ;;  %v829_v49 = vmax.f32 %v825_v33, 0.0 }
 0x204   : > { %v798_v38 = vmul.f32 %v785_v20, %v765_v31 }
 0x206   : > { %v826_v46 = vadd.f32 %v813_v44, %v798_v38 }
 0x208   : > { %v830_v48 = vmax.f32 %v826_v46, 0.0 }
 0x209   : > { %v767_v24 = vpop.f32.mrf.mxu3 }
 0x20a   : > { %v768_v28 = vadd.f32 %v767_v24, %v721_v23 }
 0x20c   : > { %v799_v36 = vmul.f32 %v790_v17, %v768_v28 }
 0x20e   : > { %v827_v43 = vadd.f32 %v818_v25, %v799_v36 }
 0x210   : > { %v831_v26 = vmax.f32 %v827_v43, 0.0 }
 0x211   : > { %v770_v32 = vpop.f32.mrf.mxu3 }
 0x212   : > { %v771_v37 = vadd.f32 %v770_v32, %v724_v30 }
 0x214   : > { %v800_v39 = vmul.f32 %v795_v34, %v771_v37 }
 0x216   : > { %v828_v41 = vadd.f32 %v823_v21, %v800_v39 }
 0x218   : > { %v832_v45 = vmax.f32 %v828_v41, 0.0 }
 0x21a   : > { %854 = vmatpush.msrb.mxu0 %v832_v45 }
 0x21c   : > { %855 = vmatpush.msrb.mxu0 %v831_v26 }
 0x21e   : > { %856 = vmatpush.msrb.mxu0 %v830_v48 }
 0x220   : > { %857 = vmatpush.msrb.mxu0 %v829_v49 }
 0x221   : > { %1050 = vmatmul.msk.f32.vlgmr.msrb.gmra.mxu0 %vm835_vm9, %v833_v50 }
 0x229   : > { %1051 = vmatmul.msk.f32.gmra.mxu0 %vm835_vm9, %v834_v42 }
 0x29e   : > { %v859_v53 = vpop.f32.mrf.mxu0 }
 0x29f   : > { %v877_v54 = vmul.f32 %v870_v51, %v859_v53 }
 0x2a1   : > { %v891_v56 = vadd.f32 %v884_v55, %v877_v54 }
 0x2a3   : > { %v893_v57 = vmax.f32 %v891_v56, 0.0 }
 0x2a5   : > { %895 = vst.msk [vmem:[%s446_s23] sm:$0xff] %vm496_vm1, %v893_v57 }
 0x2a6   : > { %v862_v58 = vpop.f32.mrf.mxu0 }
 0x2a7   : > { %v878_v59 = vmul.f32 %v875_v52, %v862_v58 }
 0x2a9   : > { %v892_v61 = vadd.f32 %v889_v60, %v878_v59 }
 0x2ab   : > { %v894_v62 = vmax.f32 %v892_v61, 0.0 }
 0x2ad   : > { %896 = vst.msk [vmem:[%s446_s23 + $0x8] sm:$0xff] %vm496_vm1, %v894_v62 }
 0x2ae   : > { %1156 = shalt.err (!%p1153_p5)
}
 0x2af   : > { %s1210_s12 = smov 128   ;;  %s1211_s23 = smov 8  }
 0x2b0   : > { %1060 = dma.vmem_to_hbm [thread:$0]  (%p1312_p4), %s912_s13, 256, %s914_s24, %s898_s20, %s1210_s12, %s1210_s12, %s1211_s23  }
 0x2b1 PF: > { %p1066_p6 = scmp.ge.s32.totalorder %s1207_s22, 2  ;;  %s928_s26 = sand.u32 1, %s1187_s17  }
 0x2b2   : > { %s929_s1 = scalar_lea.sflag [#allocation3], %s928_s26 }
 0x2b3   : > { %p1063_p7 = pnand %p1066_p6, %p1319_p8 }
 0x2b5   : > { %p1064_p9 = pneg %p1063_p7 }
 0x2b7   : > { %1182 = dma.done.wait (%p1064_p9), %s929_s1, 256  }
 0x2b8   : > { %1184 = vsyncadd (%p1064_p9), %s929_s1, 4294967040  ;;  %s24_s22 = sadd.s32 1, %s1207_s22   ;;  %s1556_s17 = smov %s1191_s18 }
 0x2b9   : > { %p21_p10 = scmp.ge.s32.totalorder %s24_s22, 4   ;;  %s1557_s18 = smov %s1195_s19 }
 0x2ba   : > { %s1558_s19 = smov %s1325_s30  ;;  %s1559_s20 = smov %s1203_s21 }
 0x2bb   : > { %s1560_s21 = smov %s1562_s25  ;;  %23 = sbr.rel (!%p21_p10) target bundleno = 7 (0x7), region = 108 }
 0x2c0   :  { %935 = vsyncpa [#allocation3], 1 }
 0x2c1   :  { %937 = vsyncpa [#allocation3 + $0x1], 1 }

</bundles_post_ra>
